<compile_context>
chip_gen: v5e
topology: v5e:2x2
jax: 0.10.0
libtpu: 0.0.40
codegen_flags: <defaults>
</compile_context>

<pallas_src>
import functools

import jax
import jax.numpy as jnp
from jax.experimental import pallas as pl
from jax.experimental.pallas import tpu as pltpu


# ---------------------------------------------------------------------------
# Tiling helper
# ---------------------------------------------------------------------------

def _tile(dim, target, align):
    """Largest `align`-multiple divisor of `dim` that is <= target.

    Falls back to the full extent (always legal: block dim == array dim)."""
    if dim <= target:
        return dim
    t = (target // align) * align
    while t >= align:
        if dim % t == 0:
            return t
        t -= align
    return dim


# ---------------------------------------------------------------------------
# Tiled matmul with optional fused LayerNorm prologue and fused
# bias / QuickGELU / residual epilogue
# ---------------------------------------------------------------------------

def _make_matmul_kernel(activation, has_bias, has_residual, has_ln, ln_eps,
                        single_k):
    def parse(refs):
        idx = 0
        x_ref = refs[idx]; idx += 1
        w_ref = refs[idx]; idx += 1
        g_ref = bl_ref = None
        if has_ln:
            g_ref = refs[idx]; idx += 1
            bl_ref = refs[idx]; idx += 1
        b_ref = None
        if has_bias:
            b_ref = refs[idx]; idx += 1
        r_ref = None
        if has_residual:
            r_ref = refs[idx]; idx += 1
        o_ref = refs[idx]; idx += 1
        return x_ref, w_ref, g_ref, bl_ref, b_ref, r_ref, o_ref, refs[idx:]

    def load_x(x_ref, g_ref, bl_ref):
        x = x_ref[...]
        if has_ln:
            # LayerNorm prologue in f32 (matches CLIP's fp32 LayerNorm).
            xf = x.astype(jnp.float32)
            mu = jnp.mean(xf, axis=-1, keepdims=True)
            var = jnp.mean(jnp.square(xf - mu), axis=-1, keepdims=True)
            xf = (xf - mu) * jax.lax.rsqrt(var + ln_eps)
            xf = xf * g_ref[...].astype(jnp.float32) \
                 + bl_ref[...].astype(jnp.float32)
            x = xf.astype(x_ref.dtype)
        return x

    def epilogue(acc, b_ref, r_ref, o_ref):
        if b_ref is not None:
            acc = acc + b_ref[...].astype(jnp.float32)
        if activation == "quick_gelu":
            # QuickGELU: x * sigmoid(1.702 * x), computed in f32.
            acc = acc * jax.nn.sigmoid(1.702 * acc)
        if r_ref is not None:
            acc = acc + r_ref[...].astype(jnp.float32)
        o_ref[...] = acc.astype(o_ref.dtype)

    if single_k:
        # K fits in one tile: no accumulator scratch, no K grid axis.
        def kernel(*refs):
            x_ref, w_ref, g_ref, bl_ref, b_ref, r_ref, o_ref, _ = parse(refs)
            x = load_x(x_ref, g_ref, bl_ref)
            acc = jnp.dot(x, w_ref[...], preferred_element_type=jnp.float32)
            epilogue(acc, b_ref, r_ref, o_ref)
        return kernel

    def kernel(*refs):
        x_ref, w_ref, g_ref, bl_ref, b_ref, r_ref, o_ref, rest = parse(refs)
        acc_ref = rest[0]
        k = pl.program_id(2)

        @pl.when(k == 0)
        def _init():
            acc_ref[...] = jnp.zeros_like(acc_ref)

        x = load_x(x_ref, g_ref, bl_ref)
        acc_ref[...] += jnp.dot(x, w_ref[...],
                                preferred_element_type=jnp.float32)

        @pl.when(k == pl.num_programs(2) - 1)
        def _finalize():
            epilogue(acc_ref[...], b_ref, r_ref, o_ref)

    return kernel


def pallas_linear(x, w, b=None, residual=None, activation=None,
                  ln_gamma=None, ln_beta=None, ln_eps=1e-5,
                  tm=256, tn=512, tk=512):
    """y = act(layernorm?(x) @ w + b) + residual.

    x:(M,K)  w:(K,N)  b:(N,)|None  residual:(M,N)|None  ln_gamma/beta:(K,)|None
    -> (M,N). When ln_gamma is given, a fp32 LayerNorm prologue is fused into
    the matmul (requires the full K dim resident, i.e. tk = K)."""
    M, K = x.shape
    K2, N = w.shape
    assert K == K2
    has_ln = ln_gamma is not None
    tm = _tile(M, tm, 8)
    tn = _tile(N, tn, 128)
    tk = K if has_ln else _tile(K, tk, 128)
    gk = K // tk
    single_k = (gk == 1)

    if single_k:
        grid = (M // tm, N // tn)
        x_map = lambda i, j: (i, 0)
        w_map = lambda i, j: (0, j)
        vec_map = lambda i, j: (0, j)
        row_map = lambda i, j: (0, 0)
        out_map = lambda i, j: (i, j)
        dims = ("parallel", "parallel")
        scratch = []
    else:
        grid = (M // tm, N // tn, gk)
        x_map = lambda i, j, k: (i, k)
        w_map = lambda i, j, k: (k, j)
        vec_map = lambda i, j, k: (0, j)
        row_map = lambda i, j, k: (0, 0)
        out_map = lambda i, j, k: (i, j)
        dims = ("parallel", "parallel", "arbitrary")
        scratch = [pltpu.VMEM((tm, tn), jnp.float32)]

    in_specs = [pl.BlockSpec((tm, tk), x_map),
                pl.BlockSpec((tk, tn), w_map)]
    args = [x, w]
    if has_ln:
        in_specs += [pl.BlockSpec((1, K), row_map),
                     pl.BlockSpec((1, K), row_map)]
        args += [ln_gamma.reshape(1, K), ln_beta.reshape(1, K)]
    if b is not None:
        in_specs.append(pl.BlockSpec((1, tn), vec_map))
        args.append(b.reshape(1, N))
    if residual is not None:
        in_specs.append(pl.BlockSpec((tm, tn), out_map))
        args.append(residual)

    kernel = _make_matmul_kernel(activation, b is not None,
                                 residual is not None, has_ln, ln_eps,
                                 single_k)

    return pl.pallas_call(
        kernel,
        out_shape=jax.ShapeDtypeStruct((M, N), x.dtype),
        grid=grid,
        in_specs=in_specs,
        out_specs=pl.BlockSpec((tm, tn), out_map),
        scratch_shapes=scratch,
        compiler_params=pltpu.CompilerParams(dimension_semantics=dims),
    )(*args)


# ---------------------------------------------------------------------------
# Row-tiled LayerNorm (fp32 internal math, matches CLIP's LayerNorm subclass)
# ---------------------------------------------------------------------------

def _layernorm_kernel(x_ref, g_ref, b_ref, o_ref, *, eps):
    x = x_ref[...].astype(jnp.float32)
    mean = jnp.mean(x, axis=-1, keepdims=True)
    var = jnp.mean(jnp.square(x - mean), axis=-1, keepdims=True)
    y = (x - mean) * jax.lax.rsqrt(var + eps)
    y = y * g_ref[...].astype(jnp.float32) + b_ref[...].astype(jnp.float32)
    o_ref[...] = y.astype(o_ref.dtype)


def pallas_layernorm(x, gamma, beta, eps=1e-5, tm=512):
    orig_shape = x.shape
    D = orig_shape[-1]
    x2 = x.reshape(-1, D)
    M = x2.shape[0]
    tm = _tile(M, tm, 8)
    out = pl.pallas_call(
        functools.partial(_layernorm_kernel, eps=eps),
        out_shape=jax.ShapeDtypeStruct((M, D), x.dtype),
        grid=(M // tm,),
        in_specs=[
            pl.BlockSpec((tm, D), lambda i: (i, 0)),
            pl.BlockSpec((1, D), lambda i: (0, 0)),
            pl.BlockSpec((1, D), lambda i: (0, 0)),
        ],
        out_specs=pl.BlockSpec((tm, D), lambda i: (i, 0)),
        compiler_params=pltpu.CompilerParams(dimension_semantics=("parallel",)),
    )(x2, gamma.reshape(1, D), beta.reshape(1, D))
    return out.reshape(orig_shape)


# ---------------------------------------------------------------------------
# Multi-head attention kernel (packed QKV input, heads sliced in-kernel,
# lane-dense (L, D) output, optional additive mask)
# ---------------------------------------------------------------------------

def _attention_body(qkv_ref, m_ref, o_ref, *, n_head, scale):
    D = o_ref.shape[-1]
    dh = D // n_head
    mask = m_ref[...].astype(jnp.float32) if m_ref is not None else None
    outs = []
    for h in range(n_head):
        q = qkv_ref[0, :, h * dh:(h + 1) * dh]                   # (L, dh)
        k = qkv_ref[0, :, D + h * dh:D + (h + 1) * dh]           # (L, dh)
        v = qkv_ref[0, :, 2 * D + h * dh:2 * D + (h + 1) * dh]   # (L, dh)
        # scores: contract the head dim (avoids an explicit transpose of k)
        s = jax.lax.dot_general(q, k, (((1,), (1,)), ((), ())),
                                preferred_element_type=jnp.float32) * scale
        if mask is not None:
            s = s + mask
        s = s - jnp.max(s, axis=-1, keepdims=True)
        p = jnp.exp(s)
        p = p * pl.reciprocal(jnp.sum(p, axis=-1, keepdims=True), approx=True)
        o = jnp.dot(p.astype(v.dtype), v, preferred_element_type=jnp.float32)
        outs.append(o)
    # single lane-dense store of the merged heads
    o_ref[0] = jnp.concatenate(outs, axis=-1).astype(o_ref.dtype)


def _attention_kernel_masked(qkv_ref, m_ref, o_ref, *, n_head, scale):
    _attention_body(qkv_ref, m_ref, o_ref, n_head=n_head, scale=scale)


def _attention_kernel_nomask(qkv_ref, o_ref, *, n_head, scale):
    _attention_body(qkv_ref, None, o_ref, n_head=n_head, scale=scale)


def pallas_attention(qkv, n_head, mask=None):
    """qkv: (B, L, 3D) packed [q|k|v]; mask: additive (L, L) or None -> (B, L, D)."""
    B, L, D3 = qkv.shape
    D = D3 // 3
    dh = D // n_head
    scale = dh ** -0.5
    qkv_spec = pl.BlockSpec((1, L, D3), lambda b: (b, 0, 0))
    out_spec = pl.BlockSpec((1, L, D), lambda b: (b, 0, 0))

    if mask is not None:
        kernel = functools.partial(_attention_kernel_masked,
                                   n_head=n_head, scale=scale)
        in_specs = [qkv_spec, pl.BlockSpec((L, L), lambda b: (0, 0))]
        args = (qkv, mask.astype(jnp.float32))
    else:
        kernel = functools.partial(_attention_kernel_nomask,
                                   n_head=n_head, scale=scale)
        in_specs = [qkv_spec]
        args = (qkv,)

    return pl.pallas_call(
        kernel,
        out_shape=jax.ShapeDtypeStruct((B, L, D), qkv.dtype),
        grid=(B,),
        in_specs=in_specs,
        out_specs=out_spec,
        compiler_params=pltpu.CompilerParams(dimension_semantics=("parallel",)),
    )(*args)


# ---------------------------------------------------------------------------
# Transformer (glue in plain JAX, compute via the Pallas kernels above)
# ---------------------------------------------------------------------------

def residual_attention_block(x, p, n_head, attn_mask):
    """Matches the reference ResidualAttentionBlock.forward exactly:
       x = ln_1(x); x = x + attn(x, x, x); x = x + mlp(ln_2(x))."""
    B, L, D = x.shape

    x = pallas_layernorm(x, p["ln1_g"], p["ln1_b"])     # x <- ln_1(x)
    x2 = x.reshape(B * L, D)

    # fused in-projection: one (D, 3D) matmul for Q|K|V
    qkv = pallas_linear(x2, p["w_qkv"], p["b_qkv"]).reshape(B, L, 3 * D)
    attn = pallas_attention(qkv, n_head, attn_mask)     # (B, L, D)

    # out-projection with the attention residual fused into the epilogue
    x = pallas_linear(attn.reshape(B * L, D), p["w_out"], p["b_out"],
                      residual=x2)                      # (B*L, D)

    # MLP: ln_2 fused as prologue of c_fc, QuickGELU fused epilogue,
    # c_proj with the MLP residual fused epilogue.
    h = pallas_linear(x, p["w_fc"], p["b_fc"], activation="quick_gelu",
                      ln_gamma=p["ln2_g"], ln_beta=p["ln2_b"])
    x = pallas_linear(h, p["w_proj"], p["b_proj"], residual=x)
    return x.reshape(B, L, D)


def transformer_forward(x, params, n_head, attn_mask=None):
    """x: (L, B, D) sequence-first (torch convention). Returns (L, B, D)."""
    x = jnp.transpose(x, (1, 0, 2))                     # (B, L, D) internally
    for p in params["blocks"]:
        x = residual_attention_block(x, p, n_head, attn_mask)
    return jnp.transpose(x, (1, 0, 2))


# ---------------------------------------------------------------------------
# Parameter initialization (CLIP's initialize_parameters scheme); weights are
# stored once in the compute dtype, already laid out as (in, out).
# ---------------------------------------------------------------------------

def init_transformer_params(key, width, layers, dtype=jnp.float32):
    attn_std = width ** -0.5
    proj_std = (width ** -0.5) * ((2 * layers) ** -0.5)
    fc_std = (2 * width) ** -0.5
    blocks = []
    for bk in jax.random.split(key, layers):
        ks = jax.random.split(bk, 4)
        blocks.append({
            "ln1_g": jnp.ones((width,), dtype),
            "ln1_b": jnp.zeros((width,), dtype),
            "ln2_g": jnp.ones((width,), dtype),
            "ln2_b": jnp.zeros((width,), dtype),
            # fused in_proj: columns are [Wq | Wk | Wv]
            "w_qkv": (attn_std * jax.random.normal(ks[0], (width, 3 * width),
                                                   jnp.float32)).astype(dtype),
            "b_qkv": jnp.zeros((3 * width,), dtype),
            "w_out": (proj_std * jax.random.normal(ks[1], (width, width),
                                                   jnp.float32)).astype(dtype),
            "b_out": jnp.zeros((width,), dtype),
            "w_fc": (fc_std * jax.random.normal(ks[2], (width, 4 * width),
                                                jnp.float32)).astype(dtype),
            "b_fc": jnp.zeros((4 * width,), dtype),
            "w_proj": (proj_std * jax.random.normal(ks[3], (4 * width, width),
                                                    jnp.float32)).astype(dtype),
            "b_proj": jnp.zeros((width,), dtype),
        })
    return {"blocks": blocks}


def build_causal_mask(L):
    m = jnp.full((L, L), float("-inf"), jnp.float32)
    return jnp.triu(m, k=1)


# ---------------------------------------------------------------------------
# Pure-JAX reference (same math as the torch module) for correctness checks
# ---------------------------------------------------------------------------

def _ln_ref(v, g, b, eps=1e-5):
    v32 = v.astype(jnp.float32)
    m = v32.mean(-1, keepdims=True)
    var = ((v32 - m) ** 2).mean(-1, keepdims=True)
    out = (v32 - m) / jnp.sqrt(var + eps) * g.astype(jnp.float32) \
          + b.astype(jnp.float32)
    return out.astype(v.dtype)


def reference_block(x, p, n_head, mask):
    B, L, D = x.shape
    dh = D // n_head
    x = _ln_ref(x, p["ln1_g"], p["ln1_b"])
    qkv = x @ p["w_qkv"] + p["b_qkv"]
    q, k, v = jnp.split(qkv, 3, axis=-1)
    q = q.reshape(B, L, n_head, dh).transpose(0, 2, 1, 3)
    k = k.reshape(B, L, n_head, dh).transpose(0, 2, 1, 3)
    v = v.reshape(B, L, n_head, dh).transpose(0, 2, 1, 3)
    s = jnp.einsum("bhqd,bhkd->bhqk", q, k) * (dh ** -0.5)
    if mask is not None:
        s = s + mask
    a = jax.nn.softmax(s, axis=-1)
    o = jnp.einsum("bhqk,bhkd->bhqd", a, v).transpose(0, 2, 1, 3).reshape(B, L, D)
    x = x + (o @ p["w_out"] + p["b_out"])
    y = _ln_ref(x, p["ln2_g"], p["ln2_b"])
    h = y @ p["w_fc"] + p["b_fc"]
    h = h * jax.nn.sigmoid(1.702 * h)
    x = x + (h @ p["w_proj"] + p["b_proj"])
    return x


def reference_forward(x, params, n_head, mask=None):
    x = jnp.transpose(x, (1, 0, 2))
    for p in params["blocks"]:
        x = reference_block(x, p, n_head, mask)
    return jnp.transpose(x, (1, 0, 2))


# ---------------------------------------------------------------------------
# Main
# ---------------------------------------------------------------------------

if __name__ == "__main__":
    L, B, D, H, LAYERS = 8, 2, 32, 4, 2

    key = jax.random.PRNGKey(0)
    k_params, k_x, k1, k2, k3, k4 = jax.random.split(key, 6)

    # 0) Exercise the K-tiled (accumulator) matmul path with fused
    #    bias + QuickGELU + residual against a plain-JAX reference.
    xk = jax.random.normal(k1, (64, 256), jnp.float32)
    wk = 0.05 * jax.random.normal(k2, (256, 128), jnp.float32)
    bk = 0.1 * jax.random.normal(k3, (128,), jnp.float32)
    rk = jax.random.normal(k4, (64, 128), jnp.float32)
    got = pallas_linear(xk, wk, bk, residual=rk, activation="quick_gelu",
                        tk=128)
    tmp = xk @ wk + bk
    ref = tmp * jax.nn.sigmoid(1.702 * tmp) + rk
    err_mm = float(jnp.max(jnp.abs(got - ref)))
    assert err_mm < 5e-2, f"tiled matmul mismatch: {err_mm}"

    # 1) f32 transformer with a causal attn_mask (CLIP text-transformer style).
    params_f32 = init_transformer_params(k_params, D, LAYERS, dtype=jnp.float32)
    x = jax.random.normal(k_x, (L, B, D), jnp.float32)
    mask = build_causal_mask(L)

    fwd_masked = jax.jit(lambda xx, pp, mm: transformer_forward(xx, pp, H, mm))
    y = fwd_masked(x, params_f32, mask)
    jax.block_until_ready(y)
    assert y.shape == (L, B, D)
    assert bool(jnp.all(jnp.isfinite(y)))

    y_ref = reference_forward(x, params_f32, H, mask)
    err = float(jnp.max(jnp.abs(y - y_ref)))
    assert err < 5e-2, f"transformer output mismatch vs reference: {err}"

    # 2) bf16 transformer without a mask (vision-transformer style, exercises
    #    the no-mask fast path and bf16 I/O with f32 accumulation).
    params_bf16 = init_transformer_params(k_params, D, LAYERS, dtype=jnp.bfloat16)
    x_bf16 = x.astype(jnp.bfloat16)
    fwd_nomask = jax.jit(lambda xx, pp: transformer_forward(xx, pp, H, None))
    y2 = fwd_nomask(x_bf16, params_bf16)
    jax.block_until_ready(y2)
    assert y2.shape == (L, B, D) and y2.dtype == jnp.bfloat16
    assert bool(jnp.all(jnp.isfinite(y2.astype(jnp.float32))))

    print("KERNEL_OK")
</pallas_src>

<mosaic_0001>
module attributes {stable_mosaic.version = 11 : i64} {
  func.func @kernel(%arg0: i32, %arg1: i32, %arg2: i32, %arg3: memref<64x128xf32, #tpu.memory_space<vmem>>, %arg4: memref<128x128xf32, #tpu.memory_space<vmem>>, %arg5: memref<1x128xf32, #tpu.memory_space<vmem>>, %arg6: memref<64x128xf32, #tpu.memory_space<vmem>>, %arg7: memref<64x128xf32, #tpu.memory_space<vmem>>, %arg8: memref<64x128xf32, #tpu.memory_space<vmem>>) attributes {dimension_semantics = [#tpu.dimension_semantics<parallel>, #tpu.dimension_semantics<parallel>, #tpu.dimension_semantics<arbitrary>], iteration_bounds = array<i64: 1, 1, 2>, scalar_prefetch = 0 : i64, scratch_operands = 1 : i64, tpu.core_type = #tpu.core_type<tc>, window_params = [{transform_indices = @transform_0, window_bounds = array<i64: 64, 128>}, {transform_indices = @transform_1, window_bounds = array<i64: 128, 128>}, {transform_indices = @transform_2, window_bounds = array<i64: 1, 128>}, {transform_indices = @transform_3, window_bounds = array<i64: 64, 128>}, {transform_indices = @transform_4, window_bounds = array<i64: 64, 128>}]} {
    %c0_i32 = arith.constant 0 : i32
    %0 = arith.cmpi eq, %arg2, %c0_i32 : i32
    %1 = arith.extui %0 : i1 to i32
    %c0_i32_0 = arith.constant 0 : i32
    %2 = arith.cmpi ne, %1, %c0_i32_0 : i32
    scf.if %2 {
      %cst_9 = arith.constant 0.000000e+00 : f32
      %12 = vector.broadcast %cst_9 : f32 to vector<64x128xf32>
      %c0_10 = arith.constant 0 : index
      %c0_11 = arith.constant 0 : index
      %13 = vector.load %arg8[%c0_10, %c0_11] : memref<64x128xf32, #tpu.memory_space<vmem>>, vector<64x128xf32>
      tpu.vector_store %arg8[%c0_10, %c0_11], %12 {strides = array<i32>} : memref<64x128xf32, #tpu.memory_space<vmem>>, vector<64x128xf32>,
    } else {
    }
    %c0 = arith.constant 0 : index
    %c0_1 = arith.constant 0 : index
    %3 = vector.load %arg3[%c0, %c0_1] : memref<64x128xf32, #tpu.memory_space<vmem>>, vector<64x128xf32>
    %c0_2 = arith.constant 0 : index
    %c0_3 = arith.constant 0 : index
    %4 = vector.load %arg8[%c0_2, %c0_3] : memref<64x128xf32, #tpu.memory_space<vmem>>, vector<64x128xf32>
    %c0_4 = arith.constant 0 : index
    %c0_5 = arith.constant 0 : index
    %5 = vector.load %arg4[%c0_4, %c0_5] : memref<128x128xf32, #tpu.memory_space<vmem>>, vector<128x128xf32>
    %cst = arith.constant dense<0.000000e+00> : vector<64x128xf32>
    %6 = tpu.matmul %3, %5, %cst {dimension_numbers = #tpu.dot_dimension_numbers<[1], [0], [0], [1], [0, 0, 1, 1], [], []>} : vector<64x128xf32>, vector<128x128xf32>, vector<64x128xf32> -> vector<64x128xf32>
    %7 = arith.addf %4, %6 : vector<64x128xf32>
    %c0_6 = arith.constant 0 : index
    %c0_7 = arith.constant 0 : index
    %8 = vector.load %arg8[%c0_6, %c0_7] : memref<64x128xf32, #tpu.memory_space<vmem>>, vector<64x128xf32>
    tpu.vector_store %arg8[%c0_6, %c0_7], %7 {strides = array<i32>} : memref<64x128xf32, #tpu.memory_space<vmem>>, vector<64x128xf32>,
    %c1_i32 = arith.constant 1 : i32
    %9 = arith.cmpi eq, %arg2, %c1_i32 : i32
    %10 = arith.extui %9 : i1 to i32
    %c0_i32_8 = arith.constant 0 : i32
    %11 = arith.cmpi ne, %10, %c0_i32_8 : i32
    scf.if %11 {
      %c0_9 = arith.constant 0 : index
      %c0_10 = arith.constant 0 : index
      %12 = vector.load %arg8[%c0_9, %c0_10] : memref<64x128xf32, #tpu.memory_space<vmem>>, vector<64x128xf32>
      %c0_11 = arith.constant 0 : index
      %c0_12 = arith.constant 0 : index
      %13 = vector.load %arg5[%c0_11, %c0_12] : memref<1x128xf32, #tpu.memory_space<vmem>>, vector<1x128xf32>
      %14 = vector.broadcast %13 : vector<1x128xf32> to vector<64x128xf32>
      %15 = arith.addf %12, %14 : vector<64x128xf32>
      %cst_13 = arith.constant 1.702000e+00 : f32
      %16 = vector.broadcast %cst_13 : f32 to vector<64x128xf32>
      %17 = arith.mulf %16, %15 : vector<64x128xf32>
      %18 = arith.negf %17 : vector<64x128xf32>
      %19 = math.exp %18 : vector<64x128xf32>
      %cst_14 = arith.constant 1.000000e+00 : f32
      %20 = vector.broadcast %cst_14 : f32 to vector<64x128xf32>
      %21 = arith.addf %20, %19 : vector<64x128xf32>
      %22 = arith.divf %20, %21 : vector<64x128xf32>
      %23 = arith.mulf %15, %22 : vector<64x128xf32>
      %c0_15 = arith.constant 0 : index
      %c0_16 = arith.constant 0 : index
      %24 = vector.load %arg6[%c0_15, %c0_16] : memref<64x128xf32, #tpu.memory_space<vmem>>, vector<64x128xf32>
      %25 = arith.addf %23, %24 : vector<64x128xf32>
      %c0_17 = arith.constant 0 : index
      %c0_18 = arith.constant 0 : index
      %26 = vector.load %arg7[%c0_17, %c0_18] : memref<64x128xf32, #tpu.memory_space<vmem>>, vector<64x128xf32>
      tpu.vector_store %arg7[%c0_17, %c0_18], %25 {strides = array<i32>} : memref<64x128xf32, #tpu.memory_space<vmem>>, vector<64x128xf32>,
    } else {
    }
    return
  }
  func.func @transform_0(%arg0: i32, %arg1: i32, %arg2: i32) -> (i32, i32) {
    %c0_i32 = arith.constant 0 : i32
    return %arg0, %arg2 : i32, i32
  }
  func.func @transform_1(%arg0: i32, %arg1: i32, %arg2: i32) -> (i32, i32) {
    %c0_i32 = arith.constant 0 : i32
    return %arg2, %arg1 : i32, i32
  }
  func.func @transform_2(%arg0: i32, %arg1: i32, %arg2: i32) -> (i32, i32) {
    %c0_i32 = arith.constant 0 : i32
    %c0_i32_0 = arith.constant 0 : i32
    return %c0_i32, %arg1 : i32, i32
  }
  func.func @transform_3(%arg0: i32, %arg1: i32, %arg2: i32) -> (i32, i32) {
    %c0_i32 = arith.constant 0 : i32
    return %arg0, %arg1 : i32, i32
  }
  func.func @transform_4(%arg0: i32, %arg1: i32, %arg2: i32) -> (i32, i32) {
    %c0_i32 = arith.constant 0 : i32
    return %arg0, %arg1 : i32, i32
  }
}

</mosaic_0001>

<bundles_post_ra>
// kernel: tpu_custom_call.1
= control target key start
LH: loop header
LB: loop body
LE: loop exit
PB: predicated region body
PF: predicated region fallthrough
CT: control target
= control target key end

     0   :  { %s1524_s0 = inlined_call_operand.hbm [shape: f32[64,256], index: 0, kind: input, shape index: {}]   ;;  %s1525_s1 = inlined_call_operand.hbm [shape: f32[256,128], index: 1, kind: input, shape index: {}]   ;;  %s1526_s2 = inlined_call_operand.vmem [shape: f32[1,128], index: 2, kind: input, shape index: {}]   ;;  %s1527_s3 = inlined_call_operand.hbm [shape: f32[64,128], index: 3, kind: input, shape index: {}]   ;;  %s1528_s4 = inlined_call_operand.hbm [shape: f32[64,128], index: 4, kind: output, shape index: {}]  }
   0x1   :  { %1531 = sst [smem:[#allocation14_spill]] %s1524_s0 }
   0x2   :  { %1532 = sst [smem:[#allocation15_spill]] %s1527_s3 }
   0x3   :  { %9 = vsyncpa [#allocation4], 0 }
   0x4   :  { %11 = vsyncpa [#allocation4 + $0x1], 0 }
   0x5   :  { %12 = vsyncpa [#allocation7], 0 }
   0x6   :  { %14 = vsyncpa [#allocation7 + $0x1], 0 }
   0x7   :  { %15 = vsyncpa [#allocation5], 0  ;;  %s1185_s15 = smov 0   ;;  %s1187_s16 = smov 0  }
   0x8   :  { %s1189_s17 = smov 0   ;;  %s1191_s18 = smov 0  }
   0x9   :  { %s1193_s19 = smov 0   ;;  %s1195_s20 = smov 0  }
   0xa LB: > { %s1214_s21 = sadd.s32 4294967295, %s1150_s20   ;;  %p62_p0 = scmp.ne.s32.totalorder %s1134_s16, %s1130_s15  ;;  %s1150_s20 = sphi %s1195_s20, %s21_s20   ;;  %s1146_s19 = sphi %s1193_s19, %s1567_s19   ;;  %s1142_s18 = sphi %s1191_s18, %s1566_s18   ;;  %s1138_s17 = sphi %s1189_s17, %s1565_s17   ;;  %s1134_s16 = sphi %s1187_s16, %s1564_s16   ;;  %s1130_s15 = sphi %s1185_s15, %s1563_s15  }
   0xb   : > { %p63_p1 = scmp.eq.s32.totalorder %s1214_s21, 0  ;;  %p777_p2 = scmp.ge.s32.totalorder %s1150_s20, 1 }
   0xc   : > { %p183_p3 = scmp.lt.s32.totalorder %s1150_s20, 3  ;;  %s1534_s3 = sld [smem:[#allocation15_spill]] }
   0xd   : > { %p1222_p4 = por %p63_p1, %p62_p0  ;;  %s1152_s27 = smov [#allocation8]  }
   0xe   : > { %p1229_p5 = pnand %p777_p2, %p183_p3  ;;  %s206_s28 = sshll.u32 %s1152_s27, 4  ;;  %s207_s28 = int_to_ptr.vmem [resolvable:$true] %s206_s28 }
   0xf   : > { %s1529_s29 = smov 128   ;;  %s1154_s30 = smov 8  }
  0x10   : > { %p865_p6 = pneg %p1229_p5  ;;  %s33_s5 = sadd.s32 1, %s1146_s19 }
  0x11   : > { %p34_p8 = scmp.ge.s32.totalorder %s33_s5, 2  ;;  %s49_s6 = sadd.s32 1, %s1138_s17 }
  0x12   : > { %s204_s25 = sshll.u32 %s1534_s3, 4  ;;  %p866_p7 = pnand %p865_p6, %p63_p1  ;;  %s205_s25 = int_to_ptr.hbm [resolvable:$true] %s204_s25 }
  0x13   : > { %p56_p9 = scmp.ne.s32.totalorder %s1138_s17, %s1134_s16  ;;  %p57_p10 = scmp.eq.s32.totalorder %s1150_s20, 0 }
  0x14   : > { %868 = dma.hbm_to_vmem [thread:$0]  (!%p866_p7), %s205_s25, 1024, %s207_s28, [#allocation7], %s1529_s29, %s1529_s29, %s1154_s30  }
  0x15   : > { %s1569_s5 = smov (%p34_p8, %s33_s5), 0  ;;  %p1247_p11 = por %p57_p10, %p56_p9 }
  0x16   : > { %p877_p12 = scmp.lt.s32.totalorder %s1150_s20, 2  ;;  %s45_s8 = ssub.s32 %s1146_s19, %s1569_s5 }
  0x17   : > { %s220_s9 = sand.u32 1, %s1138_s17   ;;  %p47_p13 = scmp.eq.s32.totalorder %s45_s8, 0 }
  0x18   : > { %s781_s10 = sshll.u32 %s220_s9, 6  ;;  %s782_s11 = sshll.u32 %s1146_s19, 3 }
  0x19   : > { %s1257_s12 = scalar_select %p47_p13, %s1138_s17, %s49_s6  }
  0x1a   : > { %s1537_s0 = sld [smem:[#allocation14_spill]]  ;;  %s224_s24 = scalar_lea.vmem [#allocation3], %s781_s10 }
  0x1b   : > { %s234_s25 = sshll.u32 %s224_s24, 4  ;;  %p1266_p0 = pnand %p877_p12, %p1247_p11  ;;  %s235_s25 = int_to_ptr.vmem [resolvable:$true] %s234_s25 }
  0x1c   : > { %s244_s28 = sand.u32 1, %s1150_s20   ;;  %s783_s6 = sshll.u32 %s220_s9, 7 }
  0x1d   : > { %s221_s8 = scalar_lea.sflag [#allocation4], %s220_s9  ;;  %s1155_s29 = smov 256  }
  0x1e   : > { %s804_s10 = sshll.u32 %s1146_s19, 7  ;;  %s245_s3 = scalar_lea.sflag [#allocation7], %s244_s28 }
  0x1f   : > { %s254_s7 = scalar_lea.hbm %s1525_s1, %s804_s10 }
  0x20   : > { %s231_s15 = scalar_lea.hbm %s1537_s0, %s782_s11  ;;  %s1539_s11 = smov 128  }
  0x21   : > { %s232_s23 = sshll.u32 %s231_s15, 4  ;;  %s248_s15 = scalar_lea.vmem [#allocation6], %s783_s6  ;;  %s233_s23 = int_to_ptr.hbm [resolvable:$true] %s232_s23 }
  0x22   : > { %872 = dma.hbm_to_vmem [thread:$0]  (!%p1266_p0), %s233_s23, 1024, %s235_s25, %s221_s8, %s1155_s29, %s1539_s11, %s1154_s30  }
  0x23   : > { %s257_s24 = sshll.u32 %s248_s15, 4  ;;  %s255_s0 = sshll.u32 %s254_s7, 4  ;;  %s258_s24 = int_to_ptr.vmem [resolvable:$true] %s257_s24  ;;  %s256_s0 = int_to_ptr.hbm [resolvable:$true] %s255_s0 }
  0x24   : > { %875 = dma.hbm_to_vmem [thread:$0]  (!%p1266_p0), %s256_s0, 2048, %s258_s24, %s245_s3, %s1539_s11, %s1539_s11, %s1154_s30  }
  0x25   : > { %269 = sbr.rel (%p1229_p5) target bundleno = 307 (0x133), region = 36  ;;  %s271_s29 = sand.u32 (!%p1229_p5), 1, %s1134_s16  }
  0x26   : > { %s787_s9 = sshll.u32 (!%p1229_p5), %s271_s29, 6  ;;  %s272_s23 = scalar_lea.sflag (!%p1229_p5), [#allocation4], %s271_s29 }
  0x27   : > { %s1287_s25 = scalar_lea.vmem (!%p1229_p5), [#allocation3], %s787_s9 }
  0x2a   : > { %1113 = dma.done.wait (%p1222_p4), %s272_s23, 1024  }
  0x2b   : > { %1115 = vsyncadd (%p1222_p4), %s272_s23, 4294966272  ;;  %s281_s27 = sand.u32 1, %s1214_s21   ;;  %s788_s28 = sshll.u32 %s271_s29, 7 }
  0x2c   : > { %s282_s0 = scalar_lea.sflag [#allocation7], %s281_s27  ;;  %s1294_s3 = scalar_lea.vmem [#allocation6], %s788_s28 }
  0x2d   : > { %1117 = dma.done.wait (%p1222_p4), %s282_s0, 2048  }
  0x2e   : > { %1119 = vsyncadd (%p1222_p4), %s282_s0, 4294965248 }
  0x2f   : > { %1121 = dma.done.wait (%p63_p1), [#allocation7], 1024  }
  0x30   : > { %1123 = vsyncadd (%p63_p1), [#allocation7], 4294966272  ;;  %p790_p2 = scmp.ne.s32.totalorder %s1142_s18, 0 }
  0x32   : > { %329 = sbr.rel (%p790_p2) target bundleno = 64 (0x40), region = 52 }
  0x37   : > { %v1156_v0 = vmov 0.0  }
  0x38   : > { %330 = vst [vmem:[#allocation2 + $0x30] sm:$0xff] %v1156_v0 }
  0x39   : > { %331 = vst [vmem:[#allocation2] sm:$0xff] %v1156_v0 }
  0x3a   : > { %332 = vst [vmem:[#allocation2 + $0x18] sm:$0xff] %v1156_v0 }
  0x3b   : > { %333 = vst [vmem:[#allocation2 + $0x10] sm:$0xff] %v1156_v0 }
  0x3c   : > { %334 = vst [vmem:[#allocation2 + $0x8] sm:$0xff] %v1156_v0 }
  0x3d   : > { %335 = vst [vmem:[#allocation2 + $0x20] sm:$0xff] %v1156_v0 }
  0x3e   : > { %336 = vst [vmem:[#allocation2 + $0x28] sm:$0xff] %v1156_v0 }
  0x3f   : > { %337 = vst [vmem:[#allocation2 + $0x38] sm:$0xff] %v1156_v0 }
  0x40 PF: > { %v369_v1 = vld [vmem:[%s1294_s3 + $0x78] sm:$0xff]  ;;  %v368_v2 = vld [vmem:[%s1294_s3 + $0x70] sm:$0xff]  ;;  %v367_v3 = vld [vmem:[%s1294_s3 + $0x68] sm:$0xff]  ;;  %p791_p1 = scmp.ne.s32.totalorder %s1142_s18, 1 }
  0x41   : > { %806 = vmatpush.msra.mxu2 %v369_v1  ;;  %807 = vmatpush.msra.mxu3 %v369_v1  ;;  %v366_v4 = vld [vmem:[%s1294_s3 + $0x60] sm:$0xff]  ;;  %v365_v5 = vld [vmem:[%s1294_s3 + $0x58] sm:$0xff]  ;;  %v364_v6 = vld [vmem:[%s1294_s3 + $0x50] sm:$0xff] }
  0x42   : > { %370 = vmatpush.msra.mxu0 %v369_v1  ;;  %805 = vmatpush.msra.mxu1 %v369_v1  ;;  %v363_v7 = vld [vmem:[%s1294_s3 + $0x48] sm:$0xff]  ;;  %v362_v8 = vld [vmem:[%s1294_s3 + $0x40] sm:$0xff]  ;;  %v361_v9 = vld [vmem:[%s1294_s3 + $0x38] sm:$0xff] }
  0x43   : > { %809 = vmatpush.msra.mxu2 %v368_v2  ;;  %810 = vmatpush.msra.mxu3 %v368_v2  ;;  %v360_v10 = vld [vmem:[%s1294_s3 + $0x30] sm:$0xff]  ;;  %v359_v11 = vld [vmem:[%s1294_s3 + $0x28] sm:$0xff]  ;;  %v358_v12 = vld [vmem:[%s1294_s3 + $0x20] sm:$0xff] }
  0x44   : > { %371 = vmatpush.msra.mxu0 %v368_v2  ;;  %808 = vmatpush.msra.mxu1 %v368_v2  ;;  %v357_v13 = vld [vmem:[%s1294_s3 + $0x18] sm:$0xff]  ;;  %v356_v14 = vld [vmem:[%s1294_s3 + $0x10] sm:$0xff]  ;;  %v355_v15 = vld [vmem:[%s1294_s3 + $0x8] sm:$0xff] }
  0x45   : > { %812 = vmatpush.msra.mxu2 %v367_v3  ;;  %813 = vmatpush.msra.mxu3 %v367_v3  ;;  %v354_v16 = vld [vmem:[%s1294_s3] sm:$0xff]  ;;  %v344_v18 = vld [vmem:[%s1287_s25 + $0x30] sm:$0xff]  ;;  %v343_v21 = vld [vmem:[%s1287_s25 + $0x28] sm:$0xff] }
  0x46   : > { %372 = vmatpush.msra.mxu0 %v367_v3  ;;  %811 = vmatpush.msra.mxu1 %v367_v3  ;;  %v342_v17 = vld [vmem:[%s1287_s25 + $0x20] sm:$0xff]  ;;  %v340_v20 = vld [vmem:[%s1287_s25 + $0x10] sm:$0xff]  ;;  %v345_v22 = vld [vmem:[%s1287_s25 + $0x38] sm:$0xff] }
  0x47   : > { %815 = vmatpush.msra.mxu2 %v366_v4  ;;  %816 = vmatpush.msra.mxu3 %v366_v4  ;;  %v338_v19 = vld [vmem:[%s1287_s25] sm:$0xff]  ;;  %v339_v23 = vld [vmem:[%s1287_s25 + $0x8] sm:$0xff]  ;;  %v341_v24 = vld [vmem:[%s1287_s25 + $0x18] sm:$0xff] }
  0x48   : > { %373 = vmatpush.msra.mxu0 %v366_v4  ;;  %814 = vmatpush.msra.mxu1 %v366_v4  ;;  %v346_v25 = vld [vmem:[#allocation2 + $0x30] sm:$0xff]  ;;  %v348_v26 = vld [vmem:[#allocation2 + $0x18] sm:$0xff]  ;;  %v350_v31 = vld [vmem:[#allocation2 + $0x8] sm:$0xff] }
  0x49   : > { %818 = vmatpush.msra.mxu2 %v365_v5  ;;  %819 = vmatpush.msra.mxu3 %v365_v5  ;;  %v352_v32 = vld [vmem:[#allocation2 + $0x28] sm:$0xff]  ;;  %v347_v37 = vld [vmem:[#allocation2] sm:$0xff]  ;;  %v349_v38 = vld [vmem:[#allocation2 + $0x10] sm:$0xff] }
  0x4a   : > { %374 = vmatpush.msra.mxu0 %v365_v5  ;;  %817 = vmatpush.msra.mxu1 %v365_v5  ;;  %v351_v43 = vld [vmem:[#allocation2 + $0x20] sm:$0xff]  ;;  %v353_v44 = vld [vmem:[#allocation2 + $0x38] sm:$0xff] }
  0x4b   : > { %821 = vmatpush.msra.mxu2 %v364_v6  ;;  %822 = vmatpush.msra.mxu3 %v364_v6 }
  0x4c   : > { %375 = vmatpush.msra.mxu0 %v364_v6  ;;  %820 = vmatpush.msra.mxu1 %v364_v6 }
  0x4d   : > { %824 = vmatpush.msra.mxu2 %v363_v7  ;;  %825 = vmatpush.msra.mxu3 %v363_v7 }
  0x4e   : > { %376 = vmatpush.msra.mxu0 %v363_v7  ;;  %823 = vmatpush.msra.mxu1 %v363_v7 }
  0x4f   : > { %827 = vmatpush.msra.mxu2 %v362_v8  ;;  %828 = vmatpush.msra.mxu3 %v362_v8 }
  0x50   : > { %377 = vmatpush.msra.mxu0 %v362_v8  ;;  %826 = vmatpush.msra.mxu1 %v362_v8 }
  0x51   : > { %830 = vmatpush.msra.mxu2 %v361_v9  ;;  %831 = vmatpush.msra.mxu3 %v361_v9 }
  0x52   : > { %378 = vmatpush.msra.mxu0 %v361_v9  ;;  %829 = vmatpush.msra.mxu1 %v361_v9 }
  0x53   : > { %833 = vmatpush.msra.mxu2 %v360_v10  ;;  %834 = vmatpush.msra.mxu3 %v360_v10 }
  0x54   : > { %379 = vmatpush.msra.mxu0 %v360_v10  ;;  %832 = vmatpush.msra.mxu1 %v360_v10 }
  0x55   : > { %836 = vmatpush.msra.mxu2 %v359_v11  ;;  %837 = vmatpush.msra.mxu3 %v359_v11 }
  0x56   : > { %380 = vmatpush.msra.mxu0 %v359_v11  ;;  %835 = vmatpush.msra.mxu1 %v359_v11 }
  0x57   : > { %839 = vmatpush.msra.mxu2 %v358_v12  ;;  %840 = vmatpush.msra.mxu3 %v358_v12 }
  0x58   : > { %381 = vmatpush.msra.mxu0 %v358_v12  ;;  %838 = vmatpush.msra.mxu1 %v358_v12 }
  0x59   : > { %842 = vmatpush.msra.mxu2 %v357_v13  ;;  %843 = vmatpush.msra.mxu3 %v357_v13 }
  0x5a   : > { %382 = vmatpush.msra.mxu0 %v357_v13  ;;  %841 = vmatpush.msra.mxu1 %v357_v13 }
  0x5b   : > { %845 = vmatpush.msra.mxu2 %v356_v14  ;;  %846 = vmatpush.msra.mxu3 %v356_v14 }
  0x5c   : > { %383 = vmatpush.msra.mxu0 %v356_v14  ;;  %844 = vmatpush.msra.mxu1 %v356_v14 }
  0x5d   : > { %848 = vmatpush.msra.mxu2 %v355_v15  ;;  %849 = vmatpush.msra.mxu3 %v355_v15 }
  0x5e   : > { %384 = vmatpush.msra.mxu0 %v355_v15  ;;  %847 = vmatpush.msra.mxu1 %v355_v15 }
  0x5f   : > { %851 = vmatpush.msra.mxu2 %v354_v16  ;;  %852 = vmatpush.msra.mxu3 %v354_v16 }
  0x60   : > { %398 = vmatmul.f32.vlgmr.msra.gmra.mxu2 %v342_v17  ;;  %404 = vmatmul.f32.vlgmr.msra.gmra.mxu3 %v344_v18 }
  0x61   : > { %385 = vmatpush.msra.mxu0 %v354_v16  ;;  %850 = vmatpush.msra.mxu1 %v354_v16 }
  0x62   : > { %386 = vmatmul.f32.vlgmr.msra.gmra.mxu0 %v338_v19  ;;  %392 = vmatmul.f32.vlgmr.msra.gmra.mxu1 %v340_v20 }
  0x68   : > { %401 = vmatmul.f32.gmra.mxu2 %v343_v21  ;;  %407 = vmatmul.f32.gmra.mxu3 %v345_v22 }
  0x6a   : > { %389 = vmatmul.f32.gmra.mxu0 %v339_v23  ;;  %395 = vmatmul.f32.gmra.mxu1 %v341_v24 }
  0xdf   : > { %v387_v27 = vpop.f32.mrf.mxu0  ;;  %v393_v28 = vpop.f32.mrf.mxu1 }
  0xe0   : > { %v411_v29 = vadd.f32 %v387_v27, %v346_v25  ;;  %v413_v30 = vadd.f32 %v393_v28, %v348_v26 }
  0xe2   : > { %419 = vst [vmem:[#allocation2 + $0x30] sm:$0xff] %v411_v29 }
  0xe3   : > { %421 = vst [vmem:[#allocation2 + $0x18] sm:$0xff] %v413_v30  ;;  %v399_v33 = vpop.f32.mrf.mxu2  ;;  %v405_v34 = vpop.f32.mrf.mxu3 }
  0xe4   : > { %v415_v35 = vadd.f32 %v399_v33, %v350_v31  ;;  %v417_v36 = vadd.f32 %v405_v34, %v352_v32 }
  0xe6   : > { %423 = vst [vmem:[#allocation2 + $0x8] sm:$0xff] %v415_v35 }
  0xe7   : > { %425 = vst [vmem:[#allocation2 + $0x28] sm:$0xff] %v417_v36  ;;  %v390_v39 = vpop.f32.mrf.mxu0  ;;  %v396_v40 = vpop.f32.mrf.mxu1 }
  0xe8   : > { %v412_v41 = vadd.f32 %v390_v39, %v347_v37  ;;  %v414_v42 = vadd.f32 %v396_v40, %v349_v38 }
  0xea   : > { %420 = vst [vmem:[#allocation2] sm:$0xff] %v412_v41 }
  0xeb   : > { %422 = vst [vmem:[#allocation2 + $0x10] sm:$0xff] %v414_v42  ;;  %v402_v45 = vpop.f32.mrf.mxu2  ;;  %v408_v46 = vpop.f32.mrf.mxu3  ;;  %430 = sbr.rel (%p791_p1) target bundleno = 301 (0x12d), region = 56 }
  0xec   : > { %v416_v47 = vadd.f32 %v402_v45, %v351_v43  ;;  %v418_v48 = vadd.f32 %v408_v46, %v353_v44 }
  0xee   : > { %424 = vst [vmem:[#allocation2 + $0x20] sm:$0xff] %v416_v47 }
  0xef   : > { %426 = vst [vmem:[#allocation2 + $0x38] sm:$0xff] %v418_v48 }
  0xf0   : > { %v431_v49 = vld [vmem:[#allocation2 + $0x30] sm:$0xff]  ;;  %v937_v50 = vld [vmem:[%s1526_s2] ss:$0 sm:$0xff]  ;;  %v433_v52 = vld [vmem:[#allocation2 + $0x18] sm:$0xff] }
  0xf1   : > { %v432_v51 = vld [vmem:[#allocation2] sm:$0xff]  ;;  %v1333_v54 = vadd.f32 %v937_v50, %v431_v49  ;;  %v1337_v56 = vadd.f32 %v937_v50, %v433_v52  ;;  %v435_v58 = vld [vmem:[#allocation2 + $0x8] sm:$0xff] }
  0xf2   : > { %v434_v53 = vld [vmem:[#allocation2 + $0x10] sm:$0xff]  ;;  %v1335_v55 = vadd.f32 %v937_v50, %v432_v51  ;;  %v1341_v60 = vadd.f32 %v937_v50, %v435_v58  ;;  %v437_v62 = vld [vmem:[#allocation2 + $0x28] sm:$0xff] }
  0xf3   : > { %v1339_v57 = vadd.f32 %v937_v50, %v434_v53  ;;  %v792_v63 = vmul.f32 -1.702, %v1333_v54  ;;  %v794_v2 = vmul.f32 -1.702, %v1337_v56  ;;  %v1350_v5 = vadd.f32 %v937_v50, %v437_v62 }
  0xf4   : > { %v793_v0 = vmul.f32 -1.702, %v1335_v55  ;;  %v796_v4 = vmul.f32 -1.702, %v1341_v60 }
  0xf5   : > { %v436_v59 = vld [vmem:[#allocation2 + $0x20] sm:$0xff]  ;;  %v795_v3 = vmul.f32 -1.702, %v1339_v57  ;;  %v467_v6 = vmul.f32 1.442695, %v792_v63 }
  0xf6   : > { %v1343_v61 = vadd.f32 %v937_v50, %v436_v59  ;;  %v438_v1 = vld [vmem:[#allocation2 + $0x38] sm:$0xff]  ;;  %v469_v7 = vmul.f32 1.442695, %v793_v0  ;;  %v471_v9 = vmul.f32 1.442695, %v794_v2 }
  0xf7   : > { %v473_v10 = vmul.f32 1.442695, %v795_v3  ;;  %938 = vpow2.f32 %v467_v6  ;;  %v475_v11 = vmul.f32 1.442695, %v796_v4  ;;  %v1353_v12 = vadd.f32 %v937_v50, %v438_v1  ;;  %v624_v3 = vld [vmem:[#allocation8 + $0x28] sm:$0xff] }
  0xf8   : > { %v797_v8 = vmul.f32 -1.702, %v1343_v61  ;;  %940 = vpow2.f32 %v469_v7  ;;  %v798_v14 = vmul.f32 -1.702, %v1350_v5 }
  0xf9   : > { %942 = vpow2.f32 %v471_v9  ;;  %v799_v16 = vmul.f32 -1.702, %v1353_v12 }
  0xfa   : > { %v477_v13 = vmul.f32 1.442695, %v797_v8  ;;  %944 = vpow2.f32 %v473_v10  ;;  %v479_v15 = vmul.f32 1.442695, %v798_v14 }
  0xfb   : > { %946 = vpow2.f32 %v475_v11  ;;  %v481_v22 = vmul.f32 1.442695, %v799_v16 }
  0xfc   : > { %948 = vpow2.f32 %v477_v13 }
  0xfd   : > { %v939_v17 = vpop.eup %938  ;;  %950 = vpow2.f32 %v479_v15 }
  0xfe   : > { %v941_v18 = vpop.eup %940  ;;  %v483_v19 = vadd.f32 1.0, %v939_v17 }
  0xff   : > { %v943_v20 = vpop.eup %942  ;;  %v1357_v21 = vadd.f32 1.0, %v941_v18 }
 0x100   : > { %v945_v23 = vpop.eup %944  ;;  %952 = vrcp.f32 %v483_v19  ;;  %v502_v24 = vand.u32 2147483648, %v483_v19  ;;  %v500_v26 = vand.u32 2147483647, %v483_v19  ;;  %v1362_v30 = vadd.f32 1.0, %v943_v20 }
 0x101   : > { %v947_v25 = vpop.eup %946  ;;  %954 = vrcp.f32 %v1357_v21  ;;  %v515_v28 = vand.u32 2147483647, %v1357_v21  ;;  %v517_v29 = vand.u32 2147483648, %v1357_v21  ;;  %v1364_v31 = vadd.f32 1.0, %v945_v23 }
 0x102   : > { %v949_v27 = vpop.eup %948  ;;  %vm496_vm0 = vweird.f32 %v483_v19  ;;  %v1366_v32 = vadd.f32 1.0, %v947_v25  ;;  %956 = vpow2.f32 %v481_v22  ;;  %v503_v33 = vor.u32 1.1754944e-38, %v502_v24  ;;  %v619_v25 = vld [vmem:[#allocation8] sm:$0xff] }
 0x103   : > { %vm511_vm1 = vweird.f32 %v1357_v21  ;;  %958 = vrcp.f32 %v1362_v30  ;;  %v532_v34 = vand.u32 2147483648, %v1362_v30  ;;  %v951_v35 = vpop.eup %950  ;;  %vm1371_vm2 = vcmp.eq.f32.partialorder %v500_v26, 8.507059e+37 }
 0x104   : > { %v530_v37 = vand.u32 2147483647, %v1362_v30  ;;  %960 = vrcp.f32 %v1364_v31  ;;  %v547_v38 = vand.u32 2147483648, %v1364_v31  ;;  %v1378_v39 = vadd.f32 1.0, %v949_v27 }
 0x105   : > { %vm1380_vm3 = vcmp.eq.f32.partialorder %v515_v28, 8.507059e+37  ;;  %v518_v42 = vor.u32 1.1754944e-38, %v517_v29  ;;  %v545_v43 = vand.u32 2147483647, %v1364_v31  ;;  %962 = vrcp.f32 %v1366_v32 }
 0x106   : > { %v953_v40 = vpop.eup %952  ;;  %vm526_vm4 = vweird.f32 %v1362_v30  ;;  %v1387_v46 = vor.u32 1.1754944e-38, %v532_v34  ;;  %vm541_vm5 = vweird.f32 %v1364_v31  ;;  %vm556_vm6 = vweird.f32 %v1366_v32 }
 0x107   : > { %v955_v44 = vpop.eup %954  ;;  %v492_v45 = vmul.f32 %v953_v40, %v483_v19  ;;  %v560_v48 = vand.u32 2147483647, %v1366_v32  ;;  %v562_v49 = vand.u32 2147483648, %v1366_v32  ;;  %vm497_vm7 = vweird.f32 %v953_v40 }
 0x108   : > { %v507_v47 = vmul.f32 %v955_v44, %v1357_v21  ;;  %v957_v50 = vpop.eup %956  ;;  %vm1394_vm8 = vcmp.eq.f32.partialorder %v530_v37, 8.507059e+37  ;;  %v548_v53 = vor.u32 1.1754944e-38, %v547_v38  ;;  %964 = vrcp.f32 %v1378_v39  ;;  %vm1412_vm13 = vmor %vm496_vm0, %vm497_vm7 }
 0x109   : > { %v493_v51 = vsub.f32 1.0, %v492_v45  ;;  %v959_v58 = vpop.eup %958  ;;  %vm512_vm9 = vweird.f32 %v955_v44  ;;  %vm1399_vm10 = vcmp.eq.f32.partialorder %v545_v43, 8.507059e+37  ;;  %v575_v63 = vand.u32 2147483647, %v1378_v39  ;;  %v621_v45 = vld [vmem:[#allocation8 + $0x10] sm:$0xff] }
 0x10a   : > { %v508_v59 = vsub.f32 1.0, %v507_v47  ;;  %v961_v0 = vpop.eup %960  ;;  %v522_v2 = vmul.f32 %v959_v58, %v1362_v30  ;;  %vm1406_vm12 = vcmp.eq.f32.partialorder %v560_v48, 8.507059e+37  ;;  %v563_v4 = vor.u32 1.1754944e-38, %v562_v49  ;;  %vm1421_vm15 = vmor %vm511_vm1, %vm512_vm9 }
 0x10b   : > { %v494_v1 = vmul.f32 %v953_v40, %v493_v51  ;;  %v963_v6 = vpop.eup %962  ;;  %vm527_vm14 = vweird.f32 %v959_v58  ;;  %v537_v9 = vmul.f32 %v961_v0, %v1364_v31  ;;  %v577_v10 = vand.u32 2147483648, %v1378_v39 }
 0x10c   : > { %v509_v8 = vmul.f32 %v955_v44, %v508_v59  ;;  %v523_v14 = vsub.f32 1.0, %v522_v2  ;;  %vm542_vm11 = vweird.f32 %v961_v0  ;;  %v552_v15 = vmul.f32 %v963_v6, %v1366_v32  ;;  %vm1439_vm1 = vmor %vm526_vm4, %vm527_vm14  ;;  %v623_v59 = vld [vmem:[#allocation8 + $0x20] sm:$0xff] }
 0x10d   : > { %v495_v11 = vadd.f32 %v953_v40, %v494_v1  ;;  %v538_v17 = vsub.f32 1.0, %v537_v9  ;;  %vm557_vm0 = vweird.f32 %v963_v6  ;;  %v1426_v18 = vadd.f32 1.0, %v951_v35 }
 0x10e   : > { %v510_v16 = vadd.f32 %v955_v44, %v509_v8  ;;  %v965_v19 = vpop.eup %964  ;;  %v524_v22 = vmul.f32 %v959_v58, %v523_v14  ;;  %v553_v23 = vsub.f32 1.0, %v552_v15  ;;  %v1430_v21 = vadd.f32 1.0, %v957_v50  ;;  %vm1458_vm4 = vmor %vm556_vm6, %vm557_vm0  ;;  %v622_v50 = vld [vmem:[#allocation8 + $0x18] sm:$0xff] }
 0x10f   : > { %v499_v20 = vsel %vm1412_vm13, %v953_v40, %v495_v11  ;;  %v539_v28 = vmul.f32 %v961_v0, %v538_v17  ;;  %v567_v29 = vmul.f32 %v965_v19, %v1378_v39  ;;  %966 = vrcp.f32 %v1426_v18 }
 0x110   : > { %v504_v24 = vsel %vm1371_vm2, %v503_v33, %v499_v20  ;;  %v514_v26 = vsel %vm1421_vm15, %v955_v44, %v510_v16  ;;  %v620_v33 = vld [vmem:[#allocation8 + $0x8] sm:$0xff]  ;;  %v525_v36 = vadd.f32 %v959_v58, %v524_v22  ;;  %vm1450_vm2 = vmor %vm541_vm5, %vm542_vm11  ;;  %v554_v30 = vmul.f32 %v963_v6, %v553_v23  ;;  %v625_v22 = vld [vmem:[#allocation8 + $0x30] sm:$0xff] }
 0x111   : > { %v611_v34 = vmul.f32 %v504_v24, %v1333_v54  ;;  %v519_v35 = vsel %vm1380_vm3, %v518_v42, %v514_v26  ;;  %v540_v40 = vadd.f32 %v961_v0, %v539_v28  ;;  %v568_v41 = vsub.f32 1.0, %v567_v29  ;;  %v626_v29 = vld [vmem:[#allocation8 + $0x38] sm:$0xff] }
 0x112   : > { %v612_v38 = vmul.f32 %v519_v35, %v1335_v55  ;;  %vm572_vm3 = vweird.f32 %v965_v19  ;;  %v529_v31 = vsel %vm1439_vm1, %v959_v58, %v525_v36  ;;  %v555_v43 = vadd.f32 %v963_v6, %v554_v30 }
 0x113   : > { %v627_v42 = vadd.f32 %v619_v25, %v611_v34  ;;  %v534_v55 = vsel %vm1394_vm8, %v1387_v46, %v529_v31  ;;  %v544_v32 = vsel %vm1450_vm2, %v961_v0, %v540_v40  ;;  %v569_v47 = vmul.f32 %v965_v19, %v568_v41 }
 0x114   : > { %v628_v44 = vadd.f32 %v620_v33, %v612_v38  ;;  %v613_v48 = vmul.f32 %v534_v55, %v1337_v56  ;;  %v549_v49 = vsel %vm1399_vm10, %v548_v53, %v544_v32  ;;  %v559_v51 = vsel %vm1458_vm4, %v963_v6, %v555_v43 }
 0x115   : > { %635 = vst [vmem:[#allocation9] sm:$0xff] %v627_v42  ;;  %vm1560_vm5 = vweird.f32 %v1378_v39  ;;  %v578_v52 = vor.u32 1.1754944e-38, %v577_v10  ;;  %v614_v58 = vmul.f32 %v549_v49, %v1339_v57  ;;  %v564_v56 = vsel %vm1406_vm12, %v563_v4, %v559_v51  ;;  %v967_v6 = vpop.eup %966 }
 0x116   : > { %vm1478_vm6 = vmor %vm1560_vm5, %vm572_vm3  ;;  %636 = vst [vmem:[#allocation9 + $0x8] sm:$0xff] %v628_v44  ;;  %v570_v53 = vadd.f32 %v965_v19, %v569_v47  ;;  %vm576_vm7 = vcmp.eq.f32.partialorder %v575_v63, 8.507059e+37  ;;  %v629_v62 = vadd.f32 %v621_v45, %v613_v48  ;;  %v615_v0 = vmul.f32 %v564_v56, %v1341_v60 }
 0x117   : > { %968 = vrcp.f32 %v1430_v21  ;;  %v630_v1 = vadd.f32 %v622_v50, %v614_v58  ;;  %v582_v39 = vmul.f32 %v967_v6, %v1426_v18  ;;  %v590_v63 = vand.u32 2147483647, %v1426_v18 }
 0x118   : > { %v574_v2 = vsel %vm1478_vm6, %v965_v19, %v570_v53  ;;  %637 = vst [vmem:[#allocation9 + $0x10] sm:$0xff] %v629_v62  ;;  %v631_v57 = vadd.f32 %v623_v59, %v615_v0  ;;  %v592_v60 = vand.u32 2147483648, %v1426_v18  ;;  %vm586_vm8 = vweird.f32 %v1426_v18 }
 0x119   : > { %v579_v7 = vsel %vm576_vm7, %v578_v52, %v574_v2  ;;  %638 = vst [vmem:[#allocation9 + $0x18] sm:$0xff] %v630_v1  ;;  %v583_v9 = vsub.f32 1.0, %v582_v39  ;;  %vm587_vm9 = vweird.f32 %v967_v6  ;;  %vm591_vm11 = vcmp.eq.f32.partialorder %v590_v63, 8.507059e+37 }
 0x11a   : > { %v616_v4 = vmul.f32 %v579_v7, %v1343_v61  ;;  %639 = vst [vmem:[#allocation9 + $0x20] sm:$0xff] %v631_v57  ;;  %vm588_vm10 = vmor %vm586_vm8, %vm587_vm9  ;;  %v593_v61 = vor.u32 1.1754944e-38, %v592_v60  ;;  %vm601_vm12 = vweird.f32 %v1430_v21  ;;  %v607_v14 = vand.u32 2147483648, %v1430_v21 }
 0x11b   : > { %v584_v11 = vmul.f32 %v967_v6, %v583_v9  ;;  %v605_v17 = vand.u32 2147483647, %v1430_v21 }
 0x11c   : > { %v632_v8 = vadd.f32 %v624_v3, %v616_v4  ;;  %v608_v23 = vor.u32 1.1754944e-38, %v607_v14 }
 0x11d   : > { %v969_v10 = vpop.eup %968  ;;  %v585_v15 = vadd.f32 %v967_v6, %v584_v11  ;;  %vm606_vm15 = vcmp.eq.f32.partialorder %v605_v17, 8.507059e+37 }
 0x11e   : > { %640 = vst [vmem:[#allocation9 + $0x28] sm:$0xff] %v632_v8  ;;  %v597_v13 = vmul.f32 %v969_v10, %v1430_v21  ;;  %vm602_vm13 = vweird.f32 %v969_v10 }
 0x11f   : > { %v589_v19 = vsel %vm588_vm10, %v967_v6, %v585_v15  ;;  %vm603_vm14 = vmor %vm601_vm12, %vm602_vm13 }
 0x120   : > { %v598_v16 = vsub.f32 1.0, %v597_v13  ;;  %v594_v20 = vsel %vm591_vm11, %v593_v61, %v589_v19 }
 0x121   : > { %v617_v24 = vmul.f32 %v594_v20, %v1350_v5 }
 0x122   : > { %v599_v18 = vmul.f32 %v969_v10, %v598_v16 }
 0x123   : > { %v633_v26 = vadd.f32 %v625_v22, %v617_v24 }
 0x124   : > { %v600_v25 = vadd.f32 %v969_v10, %v599_v18 }
 0x125   : > { %641 = vst [vmem:[#allocation9 + $0x30] sm:$0xff] %v633_v26 }
 0x126   : > { %v604_v27 = vsel %vm603_vm14, %v969_v10, %v600_v25 }
 0x127   : > { %v609_v28 = vsel %vm606_vm15, %v608_v23, %v604_v27 }
 0x128   : > { %v618_v34 = vmul.f32 %v609_v28, %v1353_v12 }
 0x12a   : > { %v634_v35 = vadd.f32 %v626_v29, %v618_v34 }
 0x12c   : > { %642 = vst [vmem:[#allocation9 + $0x38] sm:$0xff] %v634_v35 }
 0x12d PF: > { %p879_p3 = scmp.eq.s32.totalorder %s1214_s21, 1  ;;  %s654_s6 = sshll.u32 %s1528_s4, 4  ;;  %s655_s6 = int_to_ptr.hbm [resolvable:$true] %s654_s6 }
 0x12e   : > { %s1157_s8 = smov [#allocation9]   ;;  %s1158_s10 = smov 128  }
 0x12f   : > { %s652_s11 = sshll.u32 %s1157_s8, 4  ;;  %s1159_s13 = smov 8   ;;  %s653_s11 = int_to_ptr.vmem [resolvable:$true] %s652_s11 }
 0x130   : > { %862 = dma.vmem_to_hbm [thread:$0]  (%p879_p3), %s653_s11, 1024, %s655_s6, [#allocation5], %s1158_s10, %s1158_s10, %s1159_s13  }
 0x131   : > { %1125 = dma.done.wait (%p879_p3), [#allocation5], 1024  }
 0x132   : > { %1127 = vsyncadd (%p879_p3), [#allocation5], 4294966272 }
 0x133 PF: > { %s21_s20 = sadd.s32 1, %s1150_s20   ;;  %s1563_s15 = smov %s1134_s16 }
 0x134   : > { %p18_p4 = scmp.ge.s32.totalorder %s21_s20, 4   ;;  %s1564_s16 = smov %s1138_s17 }
 0x135   : > { %s1565_s17 = smov %s1257_s12  ;;  %s1566_s18 = smov %s1146_s19 }
 0x136   : > { %s1567_s19 = smov %s1569_s5  ;;  %20 = sbr.rel (!%p18_p4) target bundleno = 10 (0xa), region = 103 }
 0x13b   :  { %671 = vsyncpa [#allocation4], 1 }
 0x13c   :  { %673 = vsyncpa [#allocation4 + $0x1], 1 }
 0x13d   :  { %674 = vsyncpa [#allocation7], 1 }
 0x13e   :  { %676 = vsyncpa [#allocation7 + $0x1], 1 }
 0x13f   :  { %677 = vsyncpa [#allocation5], 1 }
 0x140   :  { %679 = vsyncpa [#allocation5 + $0x1], 1 }

</bundles_post_ra>
